<compile_context>
chip_gen: v7x
topology: tpu7x:2x2x1
jax: 0.10.0
libtpu: 0.0.40
codegen_flags: <defaults>
</compile_context>

<pallas_src>
import math

import jax
import jax.numpy as jnp
from jax.experimental import pallas as pl
from jax.experimental.pallas import tpu as pltpu


# ------------------------------------------------------------------ buffer --
def make_positional_encoding(d_model: int, max_len: int = 5000,
                             dtype=jnp.float32) -> jnp.ndarray:
    """Deterministic buffer construction matching the PyTorch __init__
    (odd-d_model cos term sliced).  Returned 2-D (max_len, d_model); the
    broadcast-only middle dim of the PyTorch buffer is dropped.  Cast once
    here so forward() does zero wrapper-side data movement."""
    position = jnp.arange(0, max_len, dtype=jnp.float32)[:, None]            # (L, 1)
    div_term = jnp.exp(
        jnp.arange(0, d_model, 2, dtype=jnp.float32) * (-math.log(10000.0) / d_model)
    )
    pe = jnp.zeros((max_len, d_model), dtype=jnp.float32)
    pe = pe.at[:, 0::2].set(jnp.sin(position * div_term))
    pe = pe.at[:, 1::2].set(jnp.cos(position * div_term[: d_model // 2]))
    return pe.astype(dtype)                                                   # (L, D)


# ------------------------------------------------------------------ kernel --
def _make_add_pe_kernel(reps: int):
    """x block is (ts, reps*D); pe block is (ts, D).  Replicate pe across the
    folded batch lanes in VMEM (VPU/XLU work, hidden under the DMA-bound add)."""
    if reps == 1:
        def kernel(x_ref, pe_ref, o_ref):
            o_ref[...] = x_ref[...] + pe_ref[...]
    else:
        def kernel(x_ref, pe_ref, o_ref):
            pe = pe_ref[...]                                   # (ts, D)
            o_ref[...] = x_ref[...] + jnp.concatenate([pe] * reps, axis=-1)
    return kernel


# ------------------------------------------------------------- tile planner --
def _choose_seq_tile(S: int, row_bytes: int, target_tile_bytes: int) -> int:
    """Rows of S per grid step: big enough to amortize ~0.35 us per-step
    overhead, small enough for double-buffered VMEM, and >=4 steps when S
    allows so both v7x TensorCores get >=2 pipelined steps each."""
    if S <= 8:
        return S
    ts = max(8, (target_tile_bytes // max(row_bytes, 1)) // 8 * 8)
    if S >= 32:
        ts = min(ts, max(8, (S // 4) // 8 * 8))   # >= 4 grid steps
    elif S >= 16:
        ts = min(ts, max(8, (S // 2) // 8 * 8))   # >= 2 grid steps
    if ts >= S:
        return S                                   # single step; block == full dim
    return ts                                      # multiple of 8


_MAX_LANE_REPS = 32                                # cap in-kernel pe fan-out


def _plan_tiles(S: int, B: int, D: int, itemsize: int, target_tile_bytes: int):
    """Returns (ts, tb): sequence rows per step and batch elements per width
    tile.  Width tiling only kicks in when 8 full-width rows would exceed the
    per-tile budget (or batch replication would be excessive); the block width
    tb*D must be a multiple of 128 lanes unless it spans the full width."""
    tb = B
    need_width_tile = B > 1 and (8 * B * D * itemsize > target_tile_bytes
                                 or B > _MAX_LANE_REPS)
    if need_width_tile:
        lane_align = 128 // math.gcd(D, 128)       # smallest tb with tb*D % 128 == 0
        budget_tb = max(1, min(target_tile_bytes // (8 * D * itemsize),
                               _MAX_LANE_REPS))
        cand = (budget_tb // lane_align) * lane_align
        if lane_align <= cand < B:
            tb = cand
        # else: keep full width (can't tile legally / not worth it)
    # TODO(synk): B == 1 with an enormous d_model would still need a D-axis
    # width tile; not needed for any realistic use of this module.
    ts = _choose_seq_tile(S, tb * D * itemsize, target_tile_bytes)
    return ts, tb


# ----------------------------------------------------------------- forward --
_PALLAS_MIN_BYTES = 1 << 20    # below this a fused XLA add beats kernel launch


def positional_encoding_forward(x: jnp.ndarray, pe: jnp.ndarray, *,
                                target_tile_bytes: int = 2 << 20,
                                force_pallas: bool = False) -> jnp.ndarray:
    """x: (S, B, D); pe: (max_len, D) from make_positional_encoding.
    Returns x + pe[:S, None, :], computed in x.dtype."""
    assert x.ndim == 3, "expected seq-first (S, B, D) input"
    S, B, D = x.shape
    assert S <= pe.shape[0], f"seq_len {S} exceeds positional buffer {pe.shape[0]}"
    assert D == pe.shape[1], f"d_model mismatch: x has {D}, pe has {pe.shape[1]}"
    if pe.dtype != x.dtype:
        # Prefer pre-casting at init (make_positional_encoding(dtype=...)); this
        # is a per-call fallback.  Low-precision x: computed in x.dtype, unlike
        # PyTorch which promotes to f32.
        pe = pe.astype(x.dtype)

    itemsize = x.dtype.itemsize
    if not force_pallas and S * B * D * itemsize < _PALLAS_MIN_BYTES:
        # Tiny problem: fixed pallas_call launch + per-step overhead dominate;
        # let XLA fuse the broadcast-add with neighbouring ops.
        return x + pe[:S][:, None, :]

    ts, tb = _plan_tiles(S, B, D, itemsize, target_tile_bytes)
    ns = pl.cdiv(S, ts)
    W = B * D
    x2 = x.reshape(S, W)                           # contiguous view; free

    # pe block's leading dim must be a multiple of 8 or span the full buffer;
    # only when S < 8 (single sub-8 block) do we slice pe to match.
    pe_use = pe if ts % 8 == 0 else pe[:S]

    if tb == B:
        grid = (ns,)
        in_specs = [pl.BlockSpec((ts, W), lambda i: (i, 0)),
                    pl.BlockSpec((ts, D), lambda i: (i, 0))]
        out_specs = pl.BlockSpec((ts, W), lambda i: (i, 0))
        dims = ("parallel",)
        reps = B
    else:
        nb = pl.cdiv(B, tb)
        tw = tb * D
        grid = (ns, nb)
        in_specs = [pl.BlockSpec((ts, tw), lambda i, j: (i, j)),
                    pl.BlockSpec((ts, D), lambda i, j: (i, 0))]
        out_specs = pl.BlockSpec((ts, tw), lambda i, j: (i, j))
        dims = ("parallel", "parallel")
        reps = tb

    out2 = pl.pallas_call(
        _make_add_pe_kernel(reps),
        out_shape=jax.ShapeDtypeStruct((S, W), x.dtype),
        grid_spec=pltpu.PrefetchScalarGridSpec(
            num_scalar_prefetch=0,
            grid=grid,
            in_specs=in_specs,
            out_specs=out_specs,
        ),
        compiler_params=pltpu.CompilerParams(
            dimension_semantics=dims,              # no cross-step carry
            vmem_limit_bytes=32 * 1024 * 1024,     # safe on v5e/v6e/v7x
        ),
    )(x2, pe_use)
    return out2.reshape(S, B, D)


# -------------------------------------------------------------------- demo --
if __name__ == "__main__":
    key = jax.random.PRNGKey(0)
    k1, k2, k3, k4 = jax.random.split(key, 4)

    # 1) Primary demo (module-consistent small shapes), Pallas path forced.
    S, B, D = 8, 2, 32
    x = jax.random.normal(k1, (S, B, D), dtype=jnp.float32)
    pe = make_positional_encoding(d_model=D, max_len=5000)
    out = jax.block_until_ready(positional_encoding_forward(x, pe, force_pallas=True))
    ref = x + pe[:S][:, None, :]
    assert out.shape == (S, B, D)
    assert jnp.allclose(out, ref, atol=1e-6), "mismatch (D=32 lane-fold path)"

    # 1b) Same inputs through the auto path (tiny -> fused XLA add fallback).
    out_auto = jax.block_until_ready(positional_encoding_forward(x, pe))
    assert jnp.allclose(out_auto, ref, atol=1e-6), "mismatch (XLA fallback path)"

    # 2) Lane-dense D % 128 == 0 path with a multi-step grid.
    S2, B2, D2 = 16, 2, 128
    x2 = jax.random.normal(k2, (S2, B2, D2), dtype=jnp.float32)
    pe2 = make_positional_encoding(d_model=D2, max_len=64)
    out2 = jax.block_until_ready(positional_encoding_forward(x2, pe2, force_pallas=True))
    ref2 = x2 + pe2[:S2][:, None, :]
    assert jnp.allclose(out2, ref2, atol=1e-6), "mismatch (D=128 path)"

    # 3) Width-tiled (2-D grid) path: small per-tile budget forces tb < B.
    S3, B3, D3 = 16, 8, 128
    x3 = jax.random.normal(k3, (S3, B3, D3), dtype=jnp.float32)
    pe3 = make_positional_encoding(d_model=D3, max_len=64)
    out3 = jax.block_until_ready(
        positional_encoding_forward(x3, pe3, target_tile_bytes=16 * 1024,
                                    force_pallas=True))
    ref3 = x3 + pe3[:S3][:, None, :]
    assert jnp.allclose(out3, ref3, atol=1e-6), "mismatch (width-tiled path)"

    # 4) S < 8 edge case (block == full dims; pe sliced to match).
    S4, B4, D4 = 4, 2, 32
    x4 = jax.random.normal(k4, (S4, B4, D4), dtype=jnp.float32)
    out4 = jax.block_until_ready(positional_encoding_forward(x4, pe, force_pallas=True))
    ref4 = x4 + pe[:S4][:, None, :]
    assert jnp.allclose(out4, ref4, atol=1e-6), "mismatch (S<8 path)"

    print("KERNEL_OK")
</pallas_src>

<mosaic_0001>
module attributes {stable_mosaic.version = 11 : i64} {
  func.func @kernel(%arg0: i32, %arg1: memref<8x64xf32, #tpu.memory_space<vmem>>, %arg2: memref<8x32xf32, #tpu.memory_space<vmem>>, %arg3: memref<8x64xf32, #tpu.memory_space<vmem>>) attributes {dimension_semantics = [#tpu.dimension_semantics<parallel>], iteration_bounds = array<i64: 1>, scalar_prefetch = 0 : i64, scratch_operands = 0 : i64, tpu.core_type = #tpu.core_type<tc>, window_params = [{transform_indices = @transform_0, window_bounds = array<i64: 8, 64>}, {transform_indices = @transform_1, window_bounds = array<i64: 8, 32>}, {transform_indices = @transform_2, window_bounds = array<i64: 8, 64>}]} {
    %c0 = arith.constant 0 : index
    %c0_0 = arith.constant 0 : index
    %0 = vector.load %arg2[%c0, %c0_0] : memref<8x32xf32, #tpu.memory_space<vmem>>, vector<8x32xf32>
    %c0_1 = arith.constant 0 : index
    %c0_2 = arith.constant 0 : index
    %1 = vector.load %arg1[%c0_1, %c0_2] : memref<8x64xf32, #tpu.memory_space<vmem>>, vector<8x64xf32>
    %2 = tpu.concatenate %0, %0 in 1 : vector<8x32xf32>, vector<8x32xf32> -> vector<8x64xf32>
    %3 = arith.addf %1, %2 : vector<8x64xf32>
    %c0_3 = arith.constant 0 : index
    %c0_4 = arith.constant 0 : index
    %4 = vector.load %arg3[%c0_3, %c0_4] : memref<8x64xf32, #tpu.memory_space<vmem>>, vector<8x64xf32>
    tpu.vector_store %arg3[%c0_3, %c0_4], %3 {strides = array<i32>} : memref<8x64xf32, #tpu.memory_space<vmem>>, vector<8x64xf32>,
    return
  }
  func.func @transform_0(%arg0: i32) -> (i32, i32) {
    %c0_i32 = arith.constant 0 : i32
    %c0_i32_0 = arith.constant 0 : i32
    return %arg0, %c0_i32 : i32, i32
  }
  func.func @transform_1(%arg0: i32) -> (i32, i32) {
    %c0_i32 = arith.constant 0 : i32
    %c0_i32_0 = arith.constant 0 : i32
    return %arg0, %c0_i32 : i32, i32
  }
  func.func @transform_2(%arg0: i32) -> (i32, i32) {
    %c0_i32 = arith.constant 0 : i32
    %c0_i32_0 = arith.constant 0 : i32
    return %arg0, %c0_i32 : i32, i32
  }
}

</mosaic_0001>

<bundles_post_ra>
// kernel: tpu_custom_call.1
= control target key start
LH: loop header
LB: loop body
LE: loop exit
PB: predicated region body
PF: predicated region fallthrough
CT: control target
= control target key end

     0   :  { %s98_s0 = inlined_call_operand.vmem [shape: f32[8,64], index: 0, kind: input, shape index: {}]   ;;  %s99_s1 = inlined_call_operand.vmem [shape: f32[5000,32], index: 1, kind: input, shape index: {}]   ;;  %s100_s2 = inlined_call_operand.hbm [shape: f32[8,64], index: 2, kind: output, shape index: {}]  }
   0x1   :  { %v12_v0 = vld [vmem:[%s99_s1] sm:$0xff] }
   0x2   :  { %7 = vsyncpa [#allocation3], 0  ;;  %s63_s11 = smov 32   ;;  %vm18_vm0 = vcmask 261120   ;;  %v13_v1 = vld [vmem:[%s98_s0] sm:$0xff]  ;;  %s64_s14 = smov [#allocation2]  }
   0x3   :  { %15 = vrot.lane.b32.xlu0 %v12_v0, %s63_s11  ;;  %s29_s15 = sshll.u32 %s64_s14, 4  ;;  %vm21_vm1 = vcmask 523264   ;;  %s30_s15 = int_to_ptr.vmem [resolvable:$true] %s29_s15 }
   0x4   :  { %s39_s16 = scalar_lea.vmem %s30_s15, 128  ;;  %p44_p1 = scmp.lt.s32.totalorder %s30_s15, %s30_s15 }
   0x5   :  { %p40_p0 = scmp.ne.s32.totalorder %s30_s15, %s39_s16  ;;  %p45_p2 = scmp.lt.s32.totalorder %s39_s16, %s39_s16 }
   0x7   :  { %p46_p3 = por %p45_p2, %p44_p1 }
   0x9   :  { %p47_p4 = pnand %p46_p3, %p40_p0 }
  0x75   :  { %v16_v2 = vpop.permute.xlu0 %15 }
  0x76   :  { %v19_v3 = vsel %vm18_vm0, %v12_v0, %v16_v2 }
  0x77   :  { %v20_v4 = vadd.f32 %v19_v3, %v13_v1 }
  0x79   :  { %22 = vst.msk [vmem:[#allocation2] sm:$0xff] %vm21_vm1, %v20_v4 }
  0x7a   :  { %50 = shalt.err (!%p47_p4)
}
  0x7b   :  { %s51_s18 = scalar_lea.hbm %s100_s2, 128 }
  0x7c   :  { %p52_p5 = scmp.ne.s32.totalorder %s100_s2, %s51_s18  ;;  %p55_p6 = scmp.lt.u32.totalorder %s51_s18, %s100_s2 }
  0x7e   :  { %p57_p7 = pnand %p55_p6, %p52_p5 }
  0x80   :  { %60 = shalt.err (!%p57_p7)
}
  0x81   :  { %32 = dma.vmem_to_hbm [thread:$0]  %s30_s15, 128, %s100_s2, [#allocation3]  }
  0x82   :  { %61 = dma.done.wait [#allocation3], 128  }
  0x83   :  { %62 = vsyncadd [#allocation3], 4294967168 }
  0x84   :  { %36 = vsyncpa [#allocation3], 1 }

</bundles_post_ra>
